<compile_context>
chip_gen: v7x
topology: tpu7x:2x2x1
jax: 0.10.0
libtpu: 0.0.40
codegen_flags: <defaults>
</compile_context>

<pallas_src>
import functools

import jax
import jax.numpy as jnp
from jax import lax
from jax.experimental import pallas as pl
from jax.experimental.pallas import tpu as pltpu

EPS = 1e-10


def _ru(x, m):
    return (x + m - 1) // m * m


def _cdiv(a, b):
    return -(-a // b)


def _vmem_capacity_bytes():
    try:
        return int(pltpu.get_tpu_info().vmem_capacity_bytes)
    except Exception:
        return 128 * 1024 * 1024


@functools.lru_cache(maxsize=None)
def _lane_to_sublane_relayout_ok(rows, cols):
    """Probe (once per shape) whether Mosaic compiles the tiny lane->sublane
    relayout (rows, cols) -> (rows, cols, 1) used for the gather index
    compare.  On failure we fall back to the padded (B, S, 1) loc layout."""
    def _probe(x_ref, o_ref):
        x3 = x_ref[...][:, :, None]
        iota = lax.broadcasted_iota(jnp.int32, (rows, cols, 128), 2)
        o_ref[...] = jnp.sum(jnp.where(iota == x3, 1.0, 0.0), axis=-1)

    try:
        fn = pl.pallas_call(
            _probe, out_shape=jax.ShapeDtypeStruct((rows, cols), jnp.float32))
        jax.jit(fn).lower(
            jax.ShapeDtypeStruct((rows, cols), jnp.int32)).compile()
        return True
    except Exception:
        return False


def _rr_loss_kernel(resp_ref, loc_ref, bnd_ref, out_ref, *, batch, sampling):
    # resp_ref: (tB, tS, HW) native dtype      bnd_ref: (tB, 1, HW) native dtype
    # loc_ref : (tB, tS) int32 (lane-dense) or (tB, tS, 1) int32 (fallback)
    # out_ref : (1, 1, 8, 128) f32 partial-sum slab
    resp = resp_ref[...]
    bnd = bnd_ref[...]
    loc = loc_ref[...]
    if loc.ndim == 2:
        loc = loc[:, :, None]          # tiny lane -> sublane relayout

    tB, tS, HW = resp.shape
    onehot = lax.broadcasted_iota(jnp.int32, (tB, tS, HW), 2) == loc

    # Selects stay in the input dtype; accumulation is always f32.
    row_sum = jnp.sum(resp, axis=-1, keepdims=True, dtype=jnp.float32)
    picked = jnp.sum(jnp.where(onehot, resp, 0), axis=-1, keepdims=True,
                     dtype=jnp.float32)
    sampled_b = jnp.sum(jnp.where(onehot, bnd, 0), axis=-1, keepdims=True,
                        dtype=jnp.float32)

    # Ragged-tail masks: blocks may overhang B / S (no wrapper-side padding),
    # so the overhang region of the VMEM tile holds garbage -> mask it out
    # before anything is accumulated (NaN/Inf in garbage rows never survive
    # the selects below).
    b_idx = (pl.program_id(0) * tB
             + lax.broadcasted_iota(jnp.int32, (tB, tS, 1), 0))
    s_idx = (pl.program_id(1) * tS
             + lax.broadcasted_iota(jnp.int32, (tB, tS, 1), 1))
    valid = (b_idx < batch) & (s_idx < sampling)

    sampled_cos = picked / row_sum     # garbage rows may be inf/nan: masked below
    term = sampled_b * -jnp.log(EPS + sampled_cos)
    num = jnp.sum(jnp.where(valid, term, 0.0))
    den = jnp.sum(jnp.where(valid, sampled_b, 0.0))

    # Unmasked full-tile store of the two partials: num -> lane 0, den -> lane 1.
    lane = lax.broadcasted_iota(jnp.int32, (1, 1, 8, 128), 3)
    sub = lax.broadcasted_iota(jnp.int32, (1, 1, 8, 128), 2)
    out_ref[...] = jnp.where((sub == 0) & (lane == 0), num,
                             jnp.where((sub == 0) & (lane == 1), den, 0.0))


def relative_response_loss(response_map, source_feature_1d_locations,
                           boundaries):
    """response_map: (B, S, H, W) f32/bf16
       source_feature_1d_locations: (B, S) int (flat indices into H*W)
       boundaries: (B, 1, H, W) f32/bf16
       returns scalar f32 loss (matches the PyTorch RelativeResponseLoss)."""
    B, S, H, W = response_map.shape
    HW = H * W

    # Native dtype pass-through (bf16 inputs halve HBM traffic).
    resp = response_map.reshape(B, S, HW)
    bnd = boundaries.reshape(B, 1, HW)
    loc = source_feature_1d_locations.astype(jnp.int32)        # (B, S)

    itemsize = jnp.dtype(resp.dtype).itemsize
    sub_q = 8 * max(1, 4 // itemsize)            # sublane quantum: 8 f32, 16 bf16
    HW_phys = _ru(HW, 128)

    vmem_cap = _vmem_capacity_bytes()
    small_vmem = vmem_cap <= 96 * 1024 * 1024    # v7x: 64 MiB per TensorCore
    target_block_bytes = (2 << 20) if small_vmem else (4 << 20)

    # ---- tile selection (no wrapper padding; ragged tails masked in-kernel).
    # Prefer full-B blocks (keeps the lane-dense loc layout legal), then
    # 128-row S tiles, then 8-row S tiles.
    rows_budget = max(8, target_block_bytes // max(1, HW_phys * itemsize))
    if rows_budget >= B * S:
        tB, tS = B, S                                           # single block
    elif S >= 128 and rows_budget >= B * 128:
        tB, tS = B, min((rows_budget // B // 128) * 128, (S // 128) * 128)
    elif rows_budget >= S:
        tB, tS = max(1, min(B, rows_budget // S)), S            # fold batches
    elif S >= 128 and rows_budget >= 128:
        tB, tS = 1, min((rows_budget // 128) * 128, (S // 128) * 128)
    elif S <= 8:
        tB, tS = 1, S
    else:
        tB, tS = 1, min((rows_budget // 8) * 8, (S // 8) * 8)

    # v7x has 2 TensorCores: make sure the (parallel) grid has enough steps.
    if small_vmem:
        while _cdiv(B, tB) * _cdiv(S, tS) < 4:
            if tB > 1:
                tB = max(1, tB // 2)
            else:
                new_tS = tS if tS <= 8 else max(8, ((tS // 2) // 8) * 8)
                if new_tS == tS:
                    break
                tS = new_tS

    nB, nS = _cdiv(B, tB), _cdiv(S, tS)

    # Lane-dense loc (B, S) is used when its 2-D block is legal and the
    # in-kernel relayout compiles; otherwise fall back to (B, S, 1).
    lane_dense_loc = ((tB == B or tB % 8 == 0)
                      and (tS == S or tS % 128 == 0)
                      and _lane_to_sublane_relayout_ok(tB, tS))
    if lane_dense_loc:
        loc_arg = loc                                           # (B, S)
        loc_spec = pl.BlockSpec((tB, tS), lambda bi, si: (bi, si))
        loc_buf = _ru(tB, 8) * _ru(tS, 128) * 4
    else:
        loc_arg = loc.reshape(B, S, 1)
        loc_spec = pl.BlockSpec((tB, tS, 1), lambda bi, si: (bi, si, 0))
        loc_buf = tB * _ru(tS, 8) * 128 * 4

    # VMEM limit from the actual double-buffered block sizes (+ headroom),
    # capped well inside the physical VMEM of the generation.
    resp_buf = tB * _ru(tS, sub_q) * HW_phys * itemsize
    bnd_buf = tB * sub_q * HW_phys * itemsize
    need = 2 * (resp_buf + bnd_buf + loc_buf) + 2 * 8 * 128 * 4 + (8 << 20)
    vmem_limit = int(min(max(need, 16 << 20),
                         (40 << 20) if small_vmem else (64 << 20)))

    cost = pl.CostEstimate(
        flops=int(5 * B * S * HW),
        transcendentals=int(B * S),
        bytes_accessed=int(resp.size * itemsize + bnd.size * itemsize
                           + loc_arg.size * 4 + nB * nS * 8 * 128 * 4))

    kernel = functools.partial(_rr_loss_kernel, batch=B, sampling=S)

    parts = pl.pallas_call(
        kernel,
        out_shape=jax.ShapeDtypeStruct((nB, nS, 8, 128), jnp.float32),
        grid_spec=pltpu.PrefetchScalarGridSpec(
            num_scalar_prefetch=0,
            # si innermost: the boundaries block index is constant in si, so
            # it is revisited without a re-DMA.  Do not reorder to (nS, nB).
            grid=(nB, nS),
            in_specs=[
                pl.BlockSpec((tB, tS, HW), lambda bi, si: (bi, si, 0)),
                loc_spec,
                pl.BlockSpec((tB, 1, HW), lambda bi, si: (bi, 0, 0)),
            ],
            out_specs=pl.BlockSpec((1, 1, 8, 128),
                                   lambda bi, si: (bi, si, 0, 0)),
        ),
        compiler_params=pltpu.CompilerParams(
            dimension_semantics=("parallel", "parallel"),
            vmem_limit_bytes=vmem_limit),
        cost_estimate=cost,
    )(resp, loc_arg, bnd)

    # Tiny final reduction over the per-tile partials.
    num_total = jnp.sum(parts[:, :, 0, 0])
    den_total = jnp.sum(parts[:, :, 0, 1])
    return num_total / (1.0 + den_total)


def _reference(response_map, loc, boundaries, eps=EPS):
    B, S, H, W = response_map.shape
    HW = H * W
    rm = response_map / jnp.sum(response_map, axis=(2, 3), keepdims=True)
    rm = rm.reshape(B, S, HW)
    bnd = boundaries.reshape(B, 1, HW)
    sampled_cos = jnp.take_along_axis(rm, loc.reshape(B, S, 1), axis=2)
    sampled_b = jnp.take_along_axis(
        jnp.broadcast_to(bnd, (B, S, HW)), loc.reshape(B, S, 1), axis=2)
    den = 1.0 + jnp.sum(sampled_b)
    return jnp.sum(sampled_b * -jnp.log(eps + sampled_cos)) / den


if __name__ == "__main__":
    key = jax.random.PRNGKey(0)
    k1, k2, k3 = jax.random.split(key, 3)

    B, S, H, W = 2, 8, 16, 16

    # Positive response map (softmax-like responses).
    response_map = jax.random.uniform(
        k1, (B, S, H, W), dtype=jnp.float32, minval=0.01, maxval=1.0)
    source_feature_1d_locations = jax.random.randint(
        k2, (B, S), minval=0, maxval=H * W, dtype=jnp.int32)
    boundaries = (jax.random.uniform(k3, (B, 1, H, W)) > 0.3).astype(jnp.float32)

    loss = relative_response_loss(
        response_map, source_feature_1d_locations, boundaries)
    loss = jax.block_until_ready(loss)

    ref = _reference(response_map, source_feature_1d_locations, boundaries)
    assert jnp.allclose(loss, ref, rtol=1e-5, atol=1e-5), (loss, ref)

    print("KERNEL_OK")
</pallas_src>

<mosaic_0001>
module attributes {stable_mosaic.version = 11 : i64} {
  func.func @_rr_loss_kernel(%arg0: i32, %arg1: i32, %arg2: memref<2x8x256xf32, #tpu.memory_space<vmem>>, %arg3: memref<2x8x1xi32, #tpu.memory_space<vmem>>, %arg4: memref<2x1x256xf32, #tpu.memory_space<vmem>>, %arg5: memref<1x1x8x128xf32, #tpu.memory_space<vmem>>) attributes {dimension_semantics = [#tpu.dimension_semantics<parallel>, #tpu.dimension_semantics<parallel>], iteration_bounds = array<i64: 1, 1>, scalar_prefetch = 0 : i64, scratch_operands = 0 : i64, tpu.core_type = #tpu.core_type<tc>, window_params = [{transform_indices = @transform_0, window_bounds = array<i64: 2, 8, 256>}, {transform_indices = @transform_1, window_bounds = array<i64: 2, 8, 1>}, {transform_indices = @transform_2, window_bounds = array<i64: 2, 1, 256>}, {transform_indices = @transform_3, window_bounds = array<i64: 1, 1, 8, 128>}]} {
    %c0 = arith.constant 0 : index
    %c0_0 = arith.constant 0 : index
    %c0_1 = arith.constant 0 : index
    %0 = vector.load %arg2[%c0, %c0_0, %c0_1] : memref<2x8x256xf32, #tpu.memory_space<vmem>>, vector<2x8x256xf32>
    %c0_2 = arith.constant 0 : index
    %c0_3 = arith.constant 0 : index
    %c0_4 = arith.constant 0 : index
    %1 = vector.load %arg4[%c0_2, %c0_3, %c0_4] : memref<2x1x256xf32, #tpu.memory_space<vmem>>, vector<2x1x256xf32>
    %c0_5 = arith.constant 0 : index
    %c0_6 = arith.constant 0 : index
    %c0_7 = arith.constant 0 : index
    %2 = vector.load %arg3[%c0_5, %c0_6, %c0_7] : memref<2x8x1xi32, #tpu.memory_space<vmem>>, vector<2x8x1xi32>
    %3 = tpu.iota {dimensions = array<i32: 2>} : vector<2x8x256xi32>
    %4 = vector.broadcast %2 : vector<2x8x1xi32> to vector<2x8x256xi32>
    %5 = arith.cmpi eq, %3, %4 : vector<2x8x256xi32>
    %cst = arith.constant dense<0.000000e+00> : vector<2x8xf32>
    %6 = vector.multi_reduction <add>, %0, %cst [2] : vector<2x8x256xf32> to vector<2x8xf32>
    %7 = vector.shape_cast %6 : vector<2x8xf32> to vector<2x8x1xf32>
    %c0_i32 = arith.constant 0 : i32
    %8 = arith.sitofp %c0_i32 : i32 to f32
    %9 = vector.broadcast %8 : f32 to vector<2x8x256xf32>
    %10 = arith.select %5, %0, %9 : vector<2x8x256xi1>, vector<2x8x256xf32>
    %cst_8 = arith.constant dense<0.000000e+00> : vector<2x8xf32>
    %11 = vector.multi_reduction <add>, %10, %cst_8 [2] : vector<2x8x256xf32> to vector<2x8xf32>
    %12 = vector.shape_cast %11 : vector<2x8xf32> to vector<2x8x1xf32>
    %c0_i32_9 = arith.constant 0 : i32
    %13 = arith.sitofp %c0_i32_9 : i32 to f32
    %14 = vector.shape_cast %1 : vector<2x1x256xf32> to vector<2x1x256xf32>
    %15 = vector.broadcast %14 : vector<2x1x256xf32> to vector<2x8x256xf32>
    %16 = vector.broadcast %13 : f32 to vector<2x8x256xf32>
    %17 = arith.select %5, %15, %16 : vector<2x8x256xi1>, vector<2x8x256xf32>
    %cst_10 = arith.constant dense<0.000000e+00> : vector<2x8xf32>
    %18 = vector.multi_reduction <add>, %17, %cst_10 [2] : vector<2x8x256xf32> to vector<2x8xf32>
    %19 = vector.shape_cast %18 : vector<2x8xf32> to vector<2x8x1xf32>
    %c2_i32 = arith.constant 2 : i32
    %20 = arith.muli %arg0, %c2_i32 : i32
    %21 = tpu.iota {dimensions = array<i32: 0>} : vector<2x8x1xi32>
    %22 = vector.broadcast %20 : i32 to vector<2x8x1xi32>
    %23 = arith.addi %22, %21 : vector<2x8x1xi32>
    %c8_i32 = arith.constant 8 : i32
    %24 = arith.muli %arg1, %c8_i32 : i32
    %25 = tpu.iota {dimensions = array<i32: 1>} : vector<2x8x1xi32>
    %26 = vector.broadcast %24 : i32 to vector<2x8x1xi32>
    %27 = arith.addi %26, %25 : vector<2x8x1xi32>
    %c2_i32_11 = arith.constant 2 : i32
    %28 = vector.broadcast %c2_i32_11 : i32 to vector<2x8x1xi32>
    %29 = arith.cmpi slt, %23, %28 : vector<2x8x1xi32>
    %c8_i32_12 = arith.constant 8 : i32
    %30 = vector.broadcast %c8_i32_12 : i32 to vector<2x8x1xi32>
    %31 = arith.cmpi slt, %27, %30 : vector<2x8x1xi32>
    %32 = arith.andi %29, %31 : vector<2x8x1xi1>
    %33 = arith.divf %12, %7 : vector<2x8x1xf32>
    %cst_13 = arith.constant 1.000000e-10 : f32
    %34 = vector.broadcast %cst_13 : f32 to vector<2x8x1xf32>
    %35 = arith.addf %34, %33 : vector<2x8x1xf32>
    %36 = math.log %35 : vector<2x8x1xf32>
    %cst_14 = arith.constant 0.000000e+00 : f32
    %37 = vector.broadcast %cst_14 : f32 to vector<2x8x1xf32>
    %38 = arith.subf %37, %36 : vector<2x8x1xf32>
    %39 = arith.mulf %19, %38 : vector<2x8x1xf32>
    %cst_15 = arith.constant 0.000000e+00 : f32
    %40 = vector.broadcast %cst_15 : f32 to vector<2x8x1xf32>
    %41 = arith.select %32, %39, %40 : vector<2x8x1xi1>, vector<2x8x1xf32>
    %42 = vector.shape_cast %41 : vector<2x8x1xf32> to vector<1x2x8x1xf32>
    %cst_16 = arith.constant dense<0.000000e+00> : vector<1xf32>
    %43 = vector.multi_reduction <add>, %42, %cst_16 [1, 2, 3] : vector<1x2x8x1xf32> to vector<1xf32>
    %44 = vector.shape_cast %43 : vector<1xf32> to vector<1x1x1x1xf32>
    %45 = vector.extract %44[0, 0, 0, 0] : f32 from vector<1x1x1x1xf32>
    %cst_17 = arith.constant 0.000000e+00 : f32
    %46 = vector.broadcast %cst_17 : f32 to vector<2x8x1xf32>
    %47 = arith.select %32, %19, %46 : vector<2x8x1xi1>, vector<2x8x1xf32>
    %48 = vector.shape_cast %47 : vector<2x8x1xf32> to vector<1x2x8x1xf32>
    %cst_18 = arith.constant dense<0.000000e+00> : vector<1xf32>
    %49 = vector.multi_reduction <add>, %48, %cst_18 [1, 2, 3] : vector<1x2x8x1xf32> to vector<1xf32>
    %50 = vector.shape_cast %49 : vector<1xf32> to vector<1x1x1x1xf32>
    %51 = vector.extract %50[0, 0, 0, 0] : f32 from vector<1x1x1x1xf32>
    %52 = tpu.iota {dimensions = array<i32: 3>} : vector<1x1x8x128xi32>
    %53 = tpu.iota {dimensions = array<i32: 2>} : vector<1x1x8x128xi32>
    %c0_i32_19 = arith.constant 0 : i32
    %54 = vector.broadcast %c0_i32_19 : i32 to vector<1x1x8x128xi32>
    %55 = arith.cmpi eq, %53, %54 : vector<1x1x8x128xi32>
    %c0_i32_20 = arith.constant 0 : i32
    %56 = vector.broadcast %c0_i32_20 : i32 to vector<1x1x8x128xi32>
    %57 = arith.cmpi eq, %52, %56 : vector<1x1x8x128xi32>
    %58 = arith.andi %55, %57 : vector<1x1x8x128xi1>
    %c0_i32_21 = arith.constant 0 : i32
    %59 = vector.broadcast %c0_i32_21 : i32 to vector<1x1x8x128xi32>
    %60 = arith.cmpi eq, %53, %59 : vector<1x1x8x128xi32>
    %c1_i32 = arith.constant 1 : i32
    %61 = vector.broadcast %c1_i32 : i32 to vector<1x1x8x128xi32>
    %62 = arith.cmpi eq, %52, %61 : vector<1x1x8x128xi32>
    %63 = arith.andi %60, %62 : vector<1x1x8x128xi1>
    %cst_22 = arith.constant 0.000000e+00 : f32
    %64 = vector.broadcast %51 : f32 to vector<1x1x8x128xf32>
    %65 = vector.broadcast %cst_22 : f32 to vector<1x1x8x128xf32>
    %66 = arith.select %63, %64, %65 : vector<1x1x8x128xi1>, vector<1x1x8x128xf32>
    %67 = vector.broadcast %45 : f32 to vector<1x1x8x128xf32>
    %68 = arith.select %58, %67, %66 : vector<1x1x8x128xi1>, vector<1x1x8x128xf32>
    %c0_23 = arith.constant 0 : index
    %c0_24 = arith.constant 0 : index
    %c0_25 = arith.constant 0 : index
    %c0_26 = arith.constant 0 : index
    %69 = vector.load %arg5[%c0_23, %c0_24, %c0_25, %c0_26] : memref<1x1x8x128xf32, #tpu.memory_space<vmem>>, vector<1x1x8x128xf32>
    tpu.vector_store %arg5[%c0_23, %c0_24, %c0_25, %c0_26], %68 {strides = array<i32>} : memref<1x1x8x128xf32, #tpu.memory_space<vmem>>, vector<1x1x8x128xf32>,
    return
  }
  func.func @transform_0(%arg0: i32, %arg1: i32) -> (i32, i32, i32) {
    %c0_i32 = arith.constant 0 : i32
    %c0_i32_0 = arith.constant 0 : i32
    return %arg0, %arg1, %c0_i32 : i32, i32, i32
  }
  func.func @transform_1(%arg0: i32, %arg1: i32) -> (i32, i32, i32) {
    %c0_i32 = arith.constant 0 : i32
    %c0_i32_0 = arith.constant 0 : i32
    return %arg0, %arg1, %c0_i32 : i32, i32, i32
  }
  func.func @transform_2(%arg0: i32, %arg1: i32) -> (i32, i32, i32) {
    %c0_i32 = arith.constant 0 : i32
    %c0_i32_0 = arith.constant 0 : i32
    %c0_i32_1 = arith.constant 0 : i32
    return %arg0, %c0_i32, %c0_i32_0 : i32, i32, i32
  }
  func.func @transform_3(%arg0: i32, %arg1: i32) -> (i32, i32, i32, i32) {
    %c0_i32 = arith.constant 0 : i32
    %c0_i32_0 = arith.constant 0 : i32
    %c0_i32_1 = arith.constant 0 : i32
    return %arg0, %arg1, %c0_i32, %c0_i32_0 : i32, i32, i32, i32
  }
}

</mosaic_0001>

<bundles_post_ra>
// kernel: tpu_custom_call.1
= control target key start
LH: loop header
LB: loop body
LE: loop exit
PB: predicated region body
PF: predicated region fallthrough
CT: control target
= control target key end

     0   :  { %8 = vsyncpa [#allocation3], 0  ;;  %s324_s0 = inlined_call_operand.hbm [shape: f32[2,8,256], index: 0, kind: input, shape index: {}]   ;;  %s325_s1 = inlined_call_operand.vmem [shape: s32[2,8,1], index: 1, kind: input, shape index: {}]   ;;  %s326_s2 = inlined_call_operand.vmem [shape: f32[2,1,256], index: 2, kind: input, shape index: {}]   ;;  %s327_s3 = inlined_call_operand.hbm [shape: f32[1,1,8,128], index: 3, kind: output, shape index: {}]  }
   0x1   :  { %9 = vsyncpa [#allocation4], 0  ;;  %s245_s12 = smov [#allocation2]   ;;  %s197_s16 = scalar_lea.hbm %s324_s0, 512 }
   0x2   :  { %s15_s13 = sshll.u32 %s245_s12, 4  ;;  %p198_p0 = scmp.ne.s32.totalorder %s324_s0, %s197_s16  ;;  %s16_s13 = int_to_ptr.vmem [resolvable:$true] %s15_s13 }
   0x3   :  { %p201_p1 = scmp.lt.u32.totalorder %s197_s16, %s324_s0 }
   0x5   :  { %p203_p2 = pnand %p201_p1, %p198_p0 }
   0x7   :  { %206 = shalt.err (!%p203_p2)
}
   0x8   :  { %s207_s21 = scalar_lea.vmem %s16_s13, 512  ;;  %p212_p4 = scmp.lt.s32.totalorder %s16_s13, %s16_s13 }
   0x9   :  { %p208_p3 = scmp.ne.s32.totalorder %s16_s13, %s207_s21  ;;  %p213_p5 = scmp.lt.s32.totalorder %s207_s21, %s207_s21 }
   0xb   :  { %p214_p6 = por %p213_p5, %p212_p4 }
   0xd   :  { %p215_p7 = pnand %p214_p6, %p208_p3 }
   0xf   :  { %218 = shalt.err (!%p215_p7)
}
  0x10   :  { %s246_s22 = smov 256   ;;  %s247_s23 = smov 16  }
  0x11   :  { %21 = dma.hbm_to_vmem [thread:$0]  %s324_s0, 512, %s16_s13, [#allocation3], %s246_s22, %s246_s22, %s247_s23  }
  0x12   :  { %241 = dma.done.wait [#allocation3], 512  }
  0x13   :  { %242 = vsyncadd [#allocation3], 4294966784  ;;  %v248_v0 = vmov 0   ;;  %v35_v1 = vld [vmem:[%s325_s1] sm:$0xff]  ;;  %v30_v3 = vld [vmem:[#allocation2 + $0x8] sm:$0xff]  ;;  %v37_v9 = vlaneseq  ;;  %vm127_vm4 = vcmask 7168  }
  0x14   :  { %188 = vset.pattern.permute.xlu0 %v248_v0  ;;  %v29_v2 = vld [vmem:[#allocation2] sm:$0xff]  ;;  %v31_v4 = vld [vmem:[#allocation2 + $0x10] sm:$0xff]  ;;  %v32_v5 = vld [vmem:[#allocation2 + $0x18] sm:$0xff]  ;;  %s249_s5 = smov [#allocation5]  }
  0x15   :  { %41 = vperm.xlu0 %188, %v35_v1   ;;  %v36_v6 = vld [vmem:[%s325_s1 + $0x8] sm:$0xff]  ;;  %v50_v7 = vadd.f32 %v30_v3, %v29_v2  ;;  %v53_v8 = vadd.f32 %v32_v5, %v31_v4  ;;  %v288_v10 = vand.u32 127, %v37_v9  ;;  %v290_v11 = vshrl.u32 %v37_v9, 7  ;;  %v33_v16 = vld [vmem:[%s326_s2] sm:$0x3]  ;;  %s170_s6 = sshll.u32 %s249_s5, 4  ;;  %s171_s6 = int_to_ptr.vmem [resolvable:$true] %s170_s6 }
  0x16   :  { %v34_v23 = vld [vmem:[%s326_s2 + $0x2] sm:$0x3]  ;;  %s219_s8 = scalar_lea.vmem %s171_s6, 128  ;;  %p224_p9 = scmp.lt.s32.totalorder %s171_s6, %s171_s6 }
  0x17   :  { %51 = vadd.xlane.f32.xlu1 %v50_v7  ;;  %v39_v12 = vadd.s32 128, %v288_v10  ;;  %v70_v14 = vsub.s32 0, %v290_v11  ;;  %v74_v15 = vsub.s32 1, %v290_v11  ;;  %vm154_vm5 = vcmp.eq.s32.totalorder %v290_v11, 0  ;;  %p220_p8 = scmp.ne.s32.totalorder %s171_s6, %s219_s8  ;;  %p225_p10 = scmp.lt.s32.totalorder %s219_s8, %s219_s8 }
  0x18   :  { %vm157_vm6 = vcmp.eq.s32.totalorder %v288_v10, 1  ;;  %vm155_vm7 = vcmp.eq.s32.totalorder %v288_v10, 0 }
  0x19   :  { %44 = vperm.xlu0 %188, %v36_v6   ;;  %v71_v21 = vrot.slane %v33_v16, %v70_v14  ;;  %v75_v22 = vrot.slane %v33_v16, %v74_v15  ;;  %v79_v29 = vrot.slane %v34_v23, %v70_v14  ;;  %v83_v30 = vrot.slane %v34_v23, %v74_v15  ;;  %vm158_vm8 = vmand %vm154_vm5, %vm157_vm6  ;;  %p226_p11 = por %p225_p10, %p224_p9 }
  0x1a   :  { %vm156_vm9 = vmand %vm154_vm5, %vm155_vm7 }
  0x1b   :  { %54 = vadd.xlane.f32.xlu1 %v53_v8  ;;  %p227_p12 = pnand %p226_p11, %p220_p8 }
  0x94   :  { %v42_v13 = vpop.permute.xlu0 %41 }
  0x95   :  { %vm46_vm0 = vcmp.eq.s32.totalorder %v288_v10, %v42_v13  ;;  %vm47_vm1 = vcmp.eq.s32.totalorder %v39_v12, %v42_v13 }
  0x96   :  { %v56_v17 = vsel %vm46_vm0, %v29_v2, 0.0  ;;  %v57_v18 = vsel %vm47_vm1, %v30_v3, 0.0  ;;  %v88_v27 = vsel %vm46_vm0, %v71_v21, 0.0  ;;  %v89_v28 = vsel %vm47_vm1, %v75_v22, 0.0 }
  0x97   :  { %v60_v19 = vadd.f32 %v57_v18, %v56_v17  ;;  %v92_v31 = vadd.f32 %v89_v28, %v88_v27 }
  0x98   :  { %v45_v20 = vpop.permute.xlu0 %44 }
  0x99   :  { %vm48_vm2 = vcmp.eq.s32.totalorder %v288_v10, %v45_v20  ;;  %vm49_vm3 = vcmp.eq.s32.totalorder %v39_v12, %v45_v20  ;;  %61 = vadd.xlane.f32.xlu0 %v60_v19 }
  0x9a   :  { %v58_v24 = vsel %vm48_vm2, %v31_v4, 0.0  ;;  %v59_v25 = vsel %vm49_vm3, %v32_v5, 0.0  ;;  %v90_v32 = vsel %vm48_vm2, %v79_v29, 0.0  ;;  %v91_v33 = vsel %vm49_vm3, %v83_v30, 0.0 }
  0x9b   :  { %v63_v26 = vadd.f32 %v59_v25, %v58_v24  ;;  %v95_v34 = vadd.f32 %v91_v33, %v90_v32 }
  0x9d   :  { %64 = vadd.xlane.f32.xlu1 %v63_v26 }
  0xa1   :  { %93 = vadd.xlane.f32.xlu1 %v92_v31 }
  0xa4   :  { %v52_v35 = vpop.xlane.xlu1 %51 }
  0xa5   :  { %96 = vadd.xlane.f32.xlu1 %v95_v34  ;;  %189 = vrcp.f32 %v52_v35 }
  0xa8   :  { %v55_v36 = vpop.xlane.xlu1 %54 }
  0xa9   :  { %191 = vrcp.f32 %v55_v36 }
  0xaf   :  { %v190_v37 = vpop.eup %189 }
  0xb3   :  { %v192_v40 = vpop.eup %191 }
 0x126   :  { %v62_v38 = vpop.xlane.xlu0 %61 }
 0x127   :  { %v112_v39 = vmul.f32 %v190_v37, %v62_v38 }
 0x129   :  { %v115_v41 = vadd.f32 1e-10, %v112_v39 }
 0x12a   :  { %v65_v42 = vpop.xlane.xlu1 %64 }
 0x12b   :  { %193 = vlog2.f32 %v115_v41  ;;  %v114_v43 = vmul.f32 %v192_v40, %v65_v42 }
 0x12d   :  { %v116_v44 = vadd.f32 1e-10, %v114_v43 }
 0x12e   :  { %v94_v47 = vpop.xlane.xlu1 %93 }
 0x12f   :  { %195 = vlog2.f32 %v116_v44  ;;  %v142_v59 = vsel %vm127_vm4, %v94_v47, 0.0 }
 0x132   :  { %v97_v53 = vpop.xlane.xlu1 %96 }
 0x133   :  { %v143_v58 = vsel %vm127_vm4, %v97_v53, 0.0 }
 0x134   :  { %v144_v60 = vadd.f32 %v143_v58, %v142_v59 }
 0x135   :  { %v194_v45 = vpop.eup %193 }
 0x136   :  { %v118_v46 = vmul.f32 0.6931472, %v194_v45 }
 0x138   :  { %v121_v48 = vsub.f32 0.0, %v118_v46 }
 0x139   :  { %v196_v49 = vpop.eup %195 }
 0x13a   :  { %v120_v50 = vmul.f32 0.6931472, %v196_v49  ;;  %v123_v51 = vmul.f32 %v121_v48, %v94_v47 }
 0x13c   :  { %v122_v52 = vsub.f32 0.0, %v120_v50  ;;  %v128_v55 = vsel %vm127_vm4, %v123_v51, 0.0 }
 0x13e   :  { %v124_v54 = vmul.f32 %v122_v52, %v97_v53 }
 0x140   :  { %v129_v56 = vsel %vm127_vm4, %v124_v54, 0.0 }
 0x141   :  { %v130_v57 = vadd.f32 %v129_v56, %v128_v55 }
 0x143   :  { %131 = vadd.xlane.f32.xlu1 %v130_v57 }
 0x147   :  { %145 = vadd.xlane.f32.xlu1 %v144_v60 }
 0x1d0   :  { %v132_v61 = vpop.xlane.xlu1 %131 }
 0x1d1   :  { %v133_v62 = vrot.slane %v132_v61, 4 }
 0x1d3   :  { %v134_v63 = vadd.f32 %v133_v62, %v132_v61 }
 0x1d4   :  { %v146_v0 = vpop.xlane.xlu1 %145 }
 0x1d5   :  { %v135_v1 = vrot.slane %v134_v63, 2  ;;  %v147_v2 = vrot.slane %v146_v0, 4 }
 0x1d7   :  { %v148_v3 = vadd.f32 %v147_v2, %v146_v0  ;;  %v136_v4 = vadd.f32 %v135_v1, %v134_v63 }
 0x1d9   :  { %v149_v5 = vrot.slane %v148_v3, 2  ;;  %v137_v6 = vrot.slane %v136_v4, 1 }
 0x1db   :  { %v150_v7 = vadd.f32 %v149_v5, %v148_v3  ;;  %v138_v8 = vadd.f32 %v137_v6, %v136_v4 }
 0x1dd   :  { %179 = vpush %v138_v8  ;;  %v151_v9 = vrot.slane %v150_v7, 1 }
 0x1df   :  { %v152_v12 = vadd.f32 %v151_v9, %v150_v7 }
 0x1e1   :  { %181 = vpush %v152_v12 }
 0x20e   :  { %s180_s2 = spop %179 }
 0x20f   :  { %v161_v14 = vstv %s180_s2 }
 0x212   :  { %s182_s7 = spop %181 }
 0x213   :  { %v159_v13 = vstv %s182_s7 }
 0x214   :  { %v160_v15 = vsel %vm158_vm8, %v159_v13, 0.0 }
 0x215   :  { %v162_v16 = vsel %vm156_vm9, %v161_v14, %v160_v15 }
 0x216   :  { %163 = vst [vmem:[#allocation5] sm:$0xff] %v162_v16 }
 0x217   :  { %230 = shalt.err (!%p227_p12)
}
 0x218   :  { %s231_s11 = scalar_lea.hbm %s327_s3, 128 }
 0x219   :  { %p232_p13 = scmp.ne.s32.totalorder %s327_s3, %s231_s11  ;;  %p235_p0 = scmp.lt.u32.totalorder %s231_s11, %s327_s3 }
 0x21b   :  { %p237_p1 = pnand %p235_p0, %p232_p13 }
 0x21d   :  { %240 = shalt.err (!%p237_p1)
}
 0x21e   :  { %173 = dma.vmem_to_hbm [thread:$0]  %s171_s6, 128, %s327_s3, [#allocation4]  }
 0x21f   :  { %243 = dma.done.wait [#allocation4], 128  }
 0x220   :  { %244 = vsyncadd [#allocation4], 4294967168 }
 0x221   :  { %177 = vsyncpa [#allocation3], 1 }
 0x222   :  { %178 = vsyncpa [#allocation4], 1 }

</bundles_post_ra>
